<compile_context>
chip_gen: v7x
topology: tpu7x:2x2x1
jax: 0.10.0
libtpu: 0.0.40
codegen_flags: <defaults>
</compile_context>

<pallas_src>
import math

import jax
import jax.numpy as jnp
from jax import lax
from jax.experimental import pallas as pl
from jax.experimental.pallas import tpu as pltpu


def _round_up(n, m):
    return (n + m - 1) // m * m


# ---------------------------------------------------------------------------
# Pallas kernel: fused transformer encoder body on a (S_pad, D_pad) tile.
# ---------------------------------------------------------------------------
def make_encoder_kernel(actual_dims, actual_seq):
    inv_sqrt_d = 1.0 / math.sqrt(actual_dims)

    def encoder_kernel(
        x_ref,
        wq1_ref, wk1_ref, wv1_ref, wo1_ref, wf1_ref, bf1_ref,
        wq2_ref, wk2_ref, wv2_ref, wo2_ref, wf2_ref, bf2_ref,
        o_ref,
    ):
        s_pad = x_ref.shape[0]
        # Padded sequence rows must not receive softmax weight as keys.
        key_idx = lax.broadcasted_iota(jnp.int32, (s_pad, s_pad), 1)
        key_mask = key_idx < actual_seq

        def self_attention(h, wq_ref, wk_ref, wv_ref, wo_ref):
            q = jnp.dot(h, wq_ref[...], preferred_element_type=jnp.float32)
            q = q * inv_sqrt_d  # scale q (S*D) instead of the SxS score matrix
            k = jnp.dot(h, wk_ref[...], preferred_element_type=jnp.float32)
            v = jnp.dot(h, wv_ref[...], preferred_element_type=jnp.float32)
            # Contract last dims directly; no explicit transpose of k.
            s = lax.dot_general(
                q, k, (((1,), (1,)), ((), ())),
                preferred_element_type=jnp.float32,
            )
            s = jnp.where(key_mask, s, -1e30)
            s = s - jnp.max(s, axis=-1, keepdims=True)
            p = jnp.exp(s)
            p = p * pl.reciprocal(jnp.sum(p, axis=-1, keepdims=True), approx=True)
            ctx = jnp.dot(p, v, preferred_element_type=jnp.float32)
            return h + jnp.dot(ctx, wo_ref[...], preferred_element_type=jnp.float32)

        def residual_tanh(h, wf_ref, bf_ref):
            y = jnp.dot(h, wf_ref[...], preferred_element_type=jnp.float32) + bf_ref[...]
            return h + jnp.tanh(y)

        h = x_ref[...]
        h = self_attention(h, wq1_ref, wk1_ref, wv1_ref, wo1_ref)
        h = residual_tanh(h, wf1_ref, bf1_ref)
        h = self_attention(h, wq2_ref, wk2_ref, wv2_ref, wo2_ref)
        h = residual_tanh(h, wf2_ref, bf2_ref)
        o_ref[...] = h

    return encoder_kernel


def encoder_pallas(x, params):
    """x: (S, D) float32 (already embedded + positional). Returns (S, D)."""
    S, D = x.shape
    S_pad = max(_round_up(S, 8), 8)
    D_pad = max(_round_up(D, 128), 128)

    def pad2(a, rows, cols):
        return jnp.pad(a, ((0, rows - a.shape[0]), (0, cols - a.shape[1])))

    x_pad = pad2(x.astype(jnp.float32), S_pad, D_pad)

    w_names = ["wq1", "wk1", "wv1", "wo1", "wf1", "bf1",
               "wq2", "wk2", "wv2", "wo2", "wf2", "bf2"]
    weights = []
    for name in w_names:
        w = params[name].astype(jnp.float32)
        if name.startswith("b"):
            weights.append(pad2(w, 1, D_pad))
        else:
            weights.append(pad2(w, D_pad, D_pad))

    vmem_spec = pl.BlockSpec(memory_space=pltpu.MemorySpace.VMEM)
    out_pad = pl.pallas_call(
        make_encoder_kernel(D, S),
        out_shape=jax.ShapeDtypeStruct((S_pad, D_pad), jnp.float32),
        in_specs=[vmem_spec] * (1 + len(weights)),
        out_specs=vmem_spec,
        input_output_aliases={0: 0},  # activation tile updated in place
        compiler_params=pltpu.CompilerParams(vmem_limit_bytes=64 * 1024 * 1024),
    )(x_pad, *weights)
    return out_pad[:S, :D]


# ---------------------------------------------------------------------------
# Parameter construction (deterministic, in-script) and JAX glue.
# ---------------------------------------------------------------------------
def init_params(key, vocab_size, dims):
    ks = jax.random.split(key, 16)

    def nrm(k, shape, std=0.1):
        return (std * jax.random.normal(k, shape)).astype(jnp.float32)

    return {
        "emb": nrm(ks[0], (vocab_size, dims)),
        "pos": nrm(ks[1], (1000, dims), std=0.01),
        "wq1": nrm(ks[2], (dims, dims)), "wk1": nrm(ks[3], (dims, dims)),
        "wv1": nrm(ks[4], (dims, dims)), "wo1": nrm(ks[5], (dims, dims)),
        "wf1": nrm(ks[6], (dims, dims)), "bf1": nrm(ks[7], (1, dims)),
        "wq2": nrm(ks[8], (dims, dims)), "wk2": nrm(ks[9], (dims, dims)),
        "wv2": nrm(ks[10], (dims, dims)), "wo2": nrm(ks[11], (dims, dims)),
        "wf2": nrm(ks[12], (dims, dims)), "bf2": nrm(ks[13], (1, dims)),
    }


@jax.jit
def encoder_forward(fnums, params):
    # Embedding lookup + positional add: plain-JAX glue (gather).
    S = fnums.shape[0]
    e = jnp.take(params["emb"], fnums, axis=0) + params["pos"][:S]
    return encoder_pallas(e.astype(jnp.float32), params)


def encoder_reference(fnums, params):
    """Pure-JAX reference for correctness checking."""
    S = fnums.shape[0]
    D = params["emb"].shape[1]
    h = jnp.take(params["emb"], fnums, axis=0) + params["pos"][:S]

    def attn(h, wq, wk, wv, wo):
        q, k, v = h @ wq, h @ wk, h @ wv
        s = (q @ k.T) / math.sqrt(D)
        p = jax.nn.softmax(s, axis=-1)
        return h + (p @ v) @ wo

    def ffn(h, w, b):
        return h + jnp.tanh(h @ w + b)

    h = attn(h, params["wq1"], params["wk1"], params["wv1"], params["wo1"])
    h = ffn(h, params["wf1"], params["bf1"])
    h = attn(h, params["wq2"], params["wk2"], params["wv2"], params["wo2"])
    h = ffn(h, params["wf2"], params["bf2"])
    return h


if __name__ == "__main__":
    vocab_size, dims, seq = 50, 32, 8
    key = jax.random.PRNGKey(0)
    kp, kt = jax.random.split(key)
    params = init_params(kp, vocab_size, dims)
    fnums = jax.random.randint(kt, (seq,), 0, vocab_size, dtype=jnp.int32)

    out = encoder_forward(fnums, params)
    out = jax.block_until_ready(out)

    ref = encoder_reference(fnums, params)
    assert out.shape == (seq, dims)
    # Slightly looser tolerance than 1e-4 because the softmax denominator uses
    # the EUP approximate reciprocal.
    assert jnp.allclose(out, ref, atol=2e-3, rtol=2e-3), "mismatch vs reference"

    print("KERNEL_OK")
</pallas_src>

<mosaic_0001>
module attributes {stable_mosaic.version = 11 : i64} {
  func.func @encoder_kernel(%arg0: memref<8x128xf32, #tpu.memory_space<vmem>>, %arg1: memref<128x128xf32, #tpu.memory_space<vmem>>, %arg2: memref<128x128xf32, #tpu.memory_space<vmem>>, %arg3: memref<128x128xf32, #tpu.memory_space<vmem>>, %arg4: memref<128x128xf32, #tpu.memory_space<vmem>>, %arg5: memref<128x128xf32, #tpu.memory_space<vmem>>, %arg6: memref<1x128xf32, #tpu.memory_space<vmem>>, %arg7: memref<128x128xf32, #tpu.memory_space<vmem>>, %arg8: memref<128x128xf32, #tpu.memory_space<vmem>>, %arg9: memref<128x128xf32, #tpu.memory_space<vmem>>, %arg10: memref<128x128xf32, #tpu.memory_space<vmem>>, %arg11: memref<128x128xf32, #tpu.memory_space<vmem>>, %arg12: memref<1x128xf32, #tpu.memory_space<vmem>>, %arg13: memref<8x128xf32, #tpu.memory_space<vmem>>) attributes {dimension_semantics = [], scalar_prefetch = 0 : i64, scratch_operands = 0 : i64, tpu.core_type = #tpu.core_type<tc>} {
    %0 = tpu.iota {dimensions = array<i32: 1>} : vector<8x8xi32>
    %c8_i32 = arith.constant 8 : i32
    %1 = vector.broadcast %c8_i32 : i32 to vector<8x8xi32>
    %2 = arith.cmpi slt, %0, %1 : vector<8x8xi32>
    %c0 = arith.constant 0 : index
    %c0_0 = arith.constant 0 : index
    %3 = vector.load %arg0[%c0, %c0_0] : memref<8x128xf32, #tpu.memory_space<vmem>>, vector<8x128xf32>
    %c0_1 = arith.constant 0 : index
    %c0_2 = arith.constant 0 : index
    %4 = vector.load %arg1[%c0_1, %c0_2] : memref<128x128xf32, #tpu.memory_space<vmem>>, vector<128x128xf32>
    %cst = arith.constant dense<0.000000e+00> : vector<8x128xf32>
    %5 = tpu.matmul %3, %4, %cst {dimension_numbers = #tpu.dot_dimension_numbers<[1], [0], [0], [1], [0, 0, 1, 1], [], []>} : vector<8x128xf32>, vector<128x128xf32>, vector<8x128xf32> -> vector<8x128xf32>
    %cst_3 = arith.constant 0.176776692 : f32
    %6 = vector.broadcast %cst_3 : f32 to vector<8x128xf32>
    %7 = arith.mulf %5, %6 : vector<8x128xf32>
    %c0_4 = arith.constant 0 : index
    %c0_5 = arith.constant 0 : index
    %8 = vector.load %arg2[%c0_4, %c0_5] : memref<128x128xf32, #tpu.memory_space<vmem>>, vector<128x128xf32>
    %cst_6 = arith.constant dense<0.000000e+00> : vector<8x128xf32>
    %9 = tpu.matmul %3, %8, %cst_6 {dimension_numbers = #tpu.dot_dimension_numbers<[1], [0], [0], [1], [0, 0, 1, 1], [], []>} : vector<8x128xf32>, vector<128x128xf32>, vector<8x128xf32> -> vector<8x128xf32>
    %c0_7 = arith.constant 0 : index
    %c0_8 = arith.constant 0 : index
    %10 = vector.load %arg3[%c0_7, %c0_8] : memref<128x128xf32, #tpu.memory_space<vmem>>, vector<128x128xf32>
    %cst_9 = arith.constant dense<0.000000e+00> : vector<8x128xf32>
    %11 = tpu.matmul %3, %10, %cst_9 {dimension_numbers = #tpu.dot_dimension_numbers<[1], [0], [0], [1], [0, 0, 1, 1], [], []>} : vector<8x128xf32>, vector<128x128xf32>, vector<8x128xf32> -> vector<8x128xf32>
    %cst_10 = arith.constant dense<0.000000e+00> : vector<8x8xf32>
    %12 = tpu.matmul %7, %9, %cst_10 {dimension_numbers = #tpu.dot_dimension_numbers<[1], [1], [0], [0], [0, 0, 1, 0], [], []>} : vector<8x128xf32>, vector<8x128xf32>, vector<8x8xf32> -> vector<8x8xf32>
    %cst_11 = arith.constant -1.000000e+30 : f32
    %13 = vector.broadcast %cst_11 : f32 to vector<8x8xf32>
    %14 = arith.select %2, %12, %13 : vector<8x8xi1>, vector<8x8xf32>
    %cst_12 = arith.constant dense<0xFF800000> : vector<8xf32>
    %15 = vector.multi_reduction <maximumf>, %14, %cst_12 [1] : vector<8x8xf32> to vector<8xf32>
    %16 = vector.shape_cast %15 : vector<8xf32> to vector<8x1xf32>
    %17 = vector.broadcast %16 : vector<8x1xf32> to vector<8x8xf32>
    %18 = arith.subf %14, %17 : vector<8x8xf32>
    %19 = math.exp %18 : vector<8x8xf32>
    %cst_13 = arith.constant dense<0.000000e+00> : vector<8xf32>
    %20 = vector.multi_reduction <add>, %19, %cst_13 [1] : vector<8x8xf32> to vector<8xf32>
    %21 = vector.shape_cast %20 : vector<8xf32> to vector<8x1xf32>
    %22 = tpu.reciprocal %21 {approx = true} : vector<8x1xf32> -> vector<8x1xf32>
    %23 = vector.broadcast %22 : vector<8x1xf32> to vector<8x8xf32>
    %24 = arith.mulf %19, %23 : vector<8x8xf32>
    %cst_14 = arith.constant dense<0.000000e+00> : vector<8x128xf32>
    %25 = tpu.matmul %24, %11, %cst_14 {dimension_numbers = #tpu.dot_dimension_numbers<[1], [0], [0], [1], [0, 0, 1, 1], [], []>} : vector<8x8xf32>, vector<8x128xf32>, vector<8x128xf32> -> vector<8x128xf32>
    %c0_15 = arith.constant 0 : index
    %c0_16 = arith.constant 0 : index
    %26 = vector.load %arg4[%c0_15, %c0_16] : memref<128x128xf32, #tpu.memory_space<vmem>>, vector<128x128xf32>
    %cst_17 = arith.constant dense<0.000000e+00> : vector<8x128xf32>
    %27 = tpu.matmul %25, %26, %cst_17 {dimension_numbers = #tpu.dot_dimension_numbers<[1], [0], [0], [1], [0, 0, 1, 1], [], []>} : vector<8x128xf32>, vector<128x128xf32>, vector<8x128xf32> -> vector<8x128xf32>
    %28 = arith.addf %3, %27 : vector<8x128xf32>
    %c0_18 = arith.constant 0 : index
    %c0_19 = arith.constant 0 : index
    %29 = vector.load %arg5[%c0_18, %c0_19] : memref<128x128xf32, #tpu.memory_space<vmem>>, vector<128x128xf32>
    %cst_20 = arith.constant dense<0.000000e+00> : vector<8x128xf32>
    %30 = tpu.matmul %28, %29, %cst_20 {dimension_numbers = #tpu.dot_dimension_numbers<[1], [0], [0], [1], [0, 0, 1, 1], [], []>} : vector<8x128xf32>, vector<128x128xf32>, vector<8x128xf32> -> vector<8x128xf32>
    %c0_21 = arith.constant 0 : index
    %c0_22 = arith.constant 0 : index
    %31 = vector.load %arg6[%c0_21, %c0_22] : memref<1x128xf32, #tpu.memory_space<vmem>>, vector<1x128xf32>
    %32 = vector.broadcast %31 : vector<1x128xf32> to vector<8x128xf32>
    %33 = arith.addf %30, %32 : vector<8x128xf32>
    %34 = math.tanh %33 : vector<8x128xf32>
    %35 = arith.addf %28, %34 : vector<8x128xf32>
    %c0_23 = arith.constant 0 : index
    %c0_24 = arith.constant 0 : index
    %36 = vector.load %arg7[%c0_23, %c0_24] : memref<128x128xf32, #tpu.memory_space<vmem>>, vector<128x128xf32>
    %cst_25 = arith.constant dense<0.000000e+00> : vector<8x128xf32>
    %37 = tpu.matmul %35, %36, %cst_25 {dimension_numbers = #tpu.dot_dimension_numbers<[1], [0], [0], [1], [0, 0, 1, 1], [], []>} : vector<8x128xf32>, vector<128x128xf32>, vector<8x128xf32> -> vector<8x128xf32>
    %cst_26 = arith.constant 0.176776692 : f32
    %38 = vector.broadcast %cst_26 : f32 to vector<8x128xf32>
    %39 = arith.mulf %37, %38 : vector<8x128xf32>
    %c0_27 = arith.constant 0 : index
    %c0_28 = arith.constant 0 : index
    %40 = vector.load %arg8[%c0_27, %c0_28] : memref<128x128xf32, #tpu.memory_space<vmem>>, vector<128x128xf32>
    %cst_29 = arith.constant dense<0.000000e+00> : vector<8x128xf32>
    %41 = tpu.matmul %35, %40, %cst_29 {dimension_numbers = #tpu.dot_dimension_numbers<[1], [0], [0], [1], [0, 0, 1, 1], [], []>} : vector<8x128xf32>, vector<128x128xf32>, vector<8x128xf32> -> vector<8x128xf32>
    %c0_30 = arith.constant 0 : index
    %c0_31 = arith.constant 0 : index
    %42 = vector.load %arg9[%c0_30, %c0_31] : memref<128x128xf32, #tpu.memory_space<vmem>>, vector<128x128xf32>
    %cst_32 = arith.constant dense<0.000000e+00> : vector<8x128xf32>
    %43 = tpu.matmul %35, %42, %cst_32 {dimension_numbers = #tpu.dot_dimension_numbers<[1], [0], [0], [1], [0, 0, 1, 1], [], []>} : vector<8x128xf32>, vector<128x128xf32>, vector<8x128xf32> -> vector<8x128xf32>
    %cst_33 = arith.constant dense<0.000000e+00> : vector<8x8xf32>
    %44 = tpu.matmul %39, %41, %cst_33 {dimension_numbers = #tpu.dot_dimension_numbers<[1], [1], [0], [0], [0, 0, 1, 0], [], []>} : vector<8x128xf32>, vector<8x128xf32>, vector<8x8xf32> -> vector<8x8xf32>
    %cst_34 = arith.constant -1.000000e+30 : f32
    %45 = vector.broadcast %cst_34 : f32 to vector<8x8xf32>
    %46 = arith.select %2, %44, %45 : vector<8x8xi1>, vector<8x8xf32>
    %cst_35 = arith.constant dense<0xFF800000> : vector<8xf32>
    %47 = vector.multi_reduction <maximumf>, %46, %cst_35 [1] : vector<8x8xf32> to vector<8xf32>
    %48 = vector.shape_cast %47 : vector<8xf32> to vector<8x1xf32>
    %49 = vector.broadcast %48 : vector<8x1xf32> to vector<8x8xf32>
    %50 = arith.subf %46, %49 : vector<8x8xf32>
    %51 = math.exp %50 : vector<8x8xf32>
    %cst_36 = arith.constant dense<0.000000e+00> : vector<8xf32>
    %52 = vector.multi_reduction <add>, %51, %cst_36 [1] : vector<8x8xf32> to vector<8xf32>
    %53 = vector.shape_cast %52 : vector<8xf32> to vector<8x1xf32>
    %54 = tpu.reciprocal %53 {approx = true} : vector<8x1xf32> -> vector<8x1xf32>
    %55 = vector.broadcast %54 : vector<8x1xf32> to vector<8x8xf32>
    %56 = arith.mulf %51, %55 : vector<8x8xf32>
    %cst_37 = arith.constant dense<0.000000e+00> : vector<8x128xf32>
    %57 = tpu.matmul %56, %43, %cst_37 {dimension_numbers = #tpu.dot_dimension_numbers<[1], [0], [0], [1], [0, 0, 1, 1], [], []>} : vector<8x8xf32>, vector<8x128xf32>, vector<8x128xf32> -> vector<8x128xf32>
    %c0_38 = arith.constant 0 : index
    %c0_39 = arith.constant 0 : index
    %58 = vector.load %arg10[%c0_38, %c0_39] : memref<128x128xf32, #tpu.memory_space<vmem>>, vector<128x128xf32>
    %cst_40 = arith.constant dense<0.000000e+00> : vector<8x128xf32>
    %59 = tpu.matmul %57, %58, %cst_40 {dimension_numbers = #tpu.dot_dimension_numbers<[1], [0], [0], [1], [0, 0, 1, 1], [], []>} : vector<8x128xf32>, vector<128x128xf32>, vector<8x128xf32> -> vector<8x128xf32>
    %60 = arith.addf %35, %59 : vector<8x128xf32>
    %c0_41 = arith.constant 0 : index
    %c0_42 = arith.constant 0 : index
    %61 = vector.load %arg11[%c0_41, %c0_42] : memref<128x128xf32, #tpu.memory_space<vmem>>, vector<128x128xf32>
    %cst_43 = arith.constant dense<0.000000e+00> : vector<8x128xf32>
    %62 = tpu.matmul %60, %61, %cst_43 {dimension_numbers = #tpu.dot_dimension_numbers<[1], [0], [0], [1], [0, 0, 1, 1], [], []>} : vector<8x128xf32>, vector<128x128xf32>, vector<8x128xf32> -> vector<8x128xf32>
    %c0_44 = arith.constant 0 : index
    %c0_45 = arith.constant 0 : index
    %63 = vector.load %arg12[%c0_44, %c0_45] : memref<1x128xf32, #tpu.memory_space<vmem>>, vector<1x128xf32>
    %64 = vector.broadcast %63 : vector<1x128xf32> to vector<8x128xf32>
    %65 = arith.addf %62, %64 : vector<8x128xf32>
    %66 = math.tanh %65 : vector<8x128xf32>
    %67 = arith.addf %60, %66 : vector<8x128xf32>
    %c0_46 = arith.constant 0 : index
    %c0_47 = arith.constant 0 : index
    %68 = vector.load %arg13[%c0_46, %c0_47] : memref<8x128xf32, #tpu.memory_space<vmem>>, vector<8x128xf32>
    tpu.vector_store %arg13[%c0_46, %c0_47], %67 {strides = array<i32>} : memref<8x128xf32, #tpu.memory_space<vmem>>, vector<8x128xf32>,
    return
  }
}

</mosaic_0001>

<bundles_post_ra>
// kernel: encoder_forward.1
= control target key start
LH: loop header
LB: loop body
LE: loop exit
PB: predicated region body
PF: predicated region fallthrough
CT: control target
= control target key end

     0   :  { %18 = vsyncpa [#allocation3], 0  ;;  %s3009_s0 = inlined_call_operand.hbm [shape: f32[8,128], index: 0, kind: input, shape index: {}, may-alias: {0,13}]   ;;  %s3010_s1 = inlined_call_operand.hbm [shape: f32[128,128], index: 1, kind: input, shape index: {}]   ;;  %s3011_s2 = inlined_call_operand.hbm [shape: f32[128,128], index: 2, kind: input, shape index: {}]   ;;  %s3012_s3 = inlined_call_operand.hbm [shape: f32[128,128], index: 3, kind: input, shape index: {}]   ;;  %s3013_s4 = inlined_call_operand.hbm [shape: f32[128,128], index: 4, kind: input, shape index: {}]   ;;  %s3014_s5 = inlined_call_operand.hbm [shape: f32[128,128], index: 5, kind: input, shape index: {}]   ;;  %s3015_s6 = inlined_call_operand.hbm [shape: f32[1,128], index: 6, kind: input, shape index: {}]   ;;  %s3016_s7 = inlined_call_operand.hbm [shape: f32[128,128], index: 7, kind: input, shape index: {}]   ;;  %s3017_s8 = inlined_call_operand.hbm [shape: f32[128,128], index: 8, kind: input, shape index: {}]   ;;  %s3018_s9 = inlined_call_operand.hbm [shape: f32[128,128], index: 9, kind: input, shape index: {}]   ;;  %s3019_s10 = inlined_call_operand.hbm [shape: f32[128,128], index: 10, kind: input, shape index: {}]   ;;  %s3020_s11 = inlined_call_operand.hbm [shape: f32[128,128], index: 11, kind: input, shape index: {}]   ;;  %s3021_s12 = inlined_call_operand.hbm [shape: f32[1,128], index: 12, kind: input, shape index: {}]   ;;  %s3022_s13 = inlined_call_operand.hbm [shape: f32[8,128], index: 13, kind: output, shape index: {}, may-alias: {0,13}]  }
   0x1   :  { %19 = vsyncpa [#allocation6], 0 }
   0x2   :  { %20 = vsyncpa [#allocation9], 0 }
   0x3   :  { %21 = vsyncpa [#allocation12], 0 }
   0x4   :  { %22 = vsyncpa [#allocation15], 0 }
   0x5   :  { %23 = vsyncpa [#allocation18], 0 }
   0x6   :  { %24 = vsyncpa [#allocation21], 0 }
   0x7   :  { %25 = vsyncpa [#allocation4], 0  ;;  %s2581_s25 = smov [#allocation5]   ;;  %s2257_s29 = scalar_lea.hbm %s3010_s1, 2048 }
   0x8   :  { %s41_s26 = sshll.u32 %s2581_s25, 4  ;;  %p2258_p0 = scmp.ne.s32.totalorder %s3010_s1, %s2257_s29  ;;  %s42_s26 = int_to_ptr.vmem [resolvable:$true] %s41_s26 }
   0x9   :  { %p2261_p1 = scmp.lt.u32.totalorder %s2257_s29, %s3010_s1 }
   0xb   :  { %p2263_p2 = pnand %p2261_p1, %p2258_p0 }
   0xd   :  { %2266 = shalt.err (!%p2263_p2)
}
   0xe   :  { %s2267_s17 = scalar_lea.vmem %s42_s26, 2048  ;;  %p2272_p4 = scmp.lt.s32.totalorder %s42_s26, %s42_s26 }
   0xf   :  { %p2268_p3 = scmp.ne.s32.totalorder %s42_s26, %s2267_s17  ;;  %p2273_p5 = scmp.lt.s32.totalorder %s2267_s17, %s2267_s17 }
  0x11   :  { %p2274_p6 = por %p2273_p5, %p2272_p4 }
  0x13   :  { %p2275_p7 = pnand %p2274_p6, %p2268_p3 }
  0x15   :  { %2278 = shalt.err (!%p2275_p7)
}
  0x16   :  { %s2582_s18 = smov 128   ;;  %s2583_s19 = smov 8  }
  0x17   :  { %47 = dma.hbm_to_vmem [thread:$0]  %s3010_s1, 2048, %s42_s26, [#allocation6], %s2582_s18, %s2582_s18, %s2583_s19  }
  0x18   :  { %s2584_s22 = smov [#allocation8]   ;;  %s2585_s24 = smov [#allocation11]  }
  0x19   :  { %s65_s23 = sshll.u32 %s2584_s22, 4  ;;  %s89_s25 = sshll.u32 %s2585_s24, 4  ;;  %s66_s23 = int_to_ptr.vmem [resolvable:$true] %s65_s23  ;;  %s90_s25 = int_to_ptr.vmem [resolvable:$true] %s89_s25 }
  0x1a   :  { %s2279_s29 = scalar_lea.hbm %s3012_s3, 2048 }
  0x1b   :  { %p2280_p8 = scmp.ne.s32.totalorder %s3012_s3, %s2279_s29  ;;  %p2283_p9 = scmp.lt.u32.totalorder %s2279_s29, %s3012_s3 }
  0x1d   :  { %p2285_p10 = pnand %p2283_p9, %p2280_p8 }
  0x1f   :  { %2288 = shalt.err (!%p2285_p10)
}
  0x20   :  { %s2289_s1 = scalar_lea.vmem %s66_s23, 2048  ;;  %p2294_p12 = scmp.lt.s32.totalorder %s66_s23, %s66_s23 }
  0x21   :  { %p2290_p11 = scmp.ne.s32.totalorder %s66_s23, %s2289_s1  ;;  %p2295_p13 = scmp.lt.s32.totalorder %s2289_s1, %s2289_s1 }
  0x23   :  { %p2296_p0 = por %p2295_p13, %p2294_p12 }
  0x25   :  { %p2297_p1 = pnand %p2296_p0, %p2290_p11 }
  0x27   :  { %2300 = shalt.err (!%p2297_p1)
}
  0x28   :  { %71 = dma.hbm_to_vmem [thread:$0]  %s3012_s3, 2048, %s66_s23, [#allocation9], %s2582_s18, %s2582_s18, %s2583_s19  }
  0x29   :  { %s2301_s22 = scalar_lea.hbm %s3014_s5, 2048 }
  0x2a   :  { %p2302_p2 = scmp.ne.s32.totalorder %s3014_s5, %s2301_s22  ;;  %p2305_p3 = scmp.lt.u32.totalorder %s2301_s22, %s3014_s5 }
  0x2c   :  { %p2307_p4 = pnand %p2305_p3, %p2302_p2 }
  0x2e   :  { %2310 = shalt.err (!%p2307_p4)
}
  0x2f   :  { %s2311_s30 = scalar_lea.vmem %s90_s25, 2048  ;;  %p2316_p6 = scmp.lt.s32.totalorder %s90_s25, %s90_s25 }
  0x30   :  { %p2312_p5 = scmp.ne.s32.totalorder %s90_s25, %s2311_s30  ;;  %p2317_p7 = scmp.lt.s32.totalorder %s2311_s30, %s2311_s30 }
  0x32   :  { %p2318_p8 = por %p2317_p7, %p2316_p6 }
  0x34   :  { %p2319_p9 = pnand %p2318_p8, %p2312_p5 }
  0x36   :  { %2322 = shalt.err (!%p2319_p9)
}
  0x37   :  { %95 = dma.hbm_to_vmem [thread:$0]  %s3014_s5, 2048, %s90_s25, [#allocation12], %s2582_s18, %s2582_s18, %s2583_s19  }
  0x38   :  { %s2586_s14 = smov [#allocation14]   ;;  %s2587_s16 = smov [#allocation17]  }
  0x39   :  { %s111_s15 = sshll.u32 %s2586_s14, 4  ;;  %s135_s1 = sshll.u32 %s2587_s16, 4  ;;  %s112_s15 = int_to_ptr.vmem [resolvable:$true] %s111_s15  ;;  %s136_s1 = int_to_ptr.vmem [resolvable:$true] %s135_s1 }
  0x3a   :  { %s2323_s20 = scalar_lea.hbm %s3016_s7, 2048 }
  0x3b   :  { %p2324_p10 = scmp.ne.s32.totalorder %s3016_s7, %s2323_s20  ;;  %p2327_p11 = scmp.lt.u32.totalorder %s2323_s20, %s3016_s7 }
  0x3d   :  { %p2329_p12 = pnand %p2327_p11, %p2324_p10 }
  0x3f   :  { %2332 = shalt.err (!%p2329_p12)
}
  0x40   :  { %s2333_s5 = scalar_lea.vmem %s112_s15, 2048  ;;  %p2338_p0 = scmp.lt.s32.totalorder %s112_s15, %s112_s15 }
  0x41   :  { %p2334_p13 = scmp.ne.s32.totalorder %s112_s15, %s2333_s5  ;;  %p2339_p1 = scmp.lt.s32.totalorder %s2333_s5, %s2333_s5 }
  0x43   :  { %p2340_p2 = por %p2339_p1, %p2338_p0 }
  0x45   :  { %p2341_p3 = pnand %p2340_p2, %p2334_p13 }
  0x47   :  { %2344 = shalt.err (!%p2341_p3)
}
  0x48   :  { %117 = dma.hbm_to_vmem [thread:$0]  %s3016_s7, 2048, %s112_s15, [#allocation15], %s2582_s18, %s2582_s18, %s2583_s19  }
  0x49   :  { %s2345_s3 = scalar_lea.hbm %s3018_s9, 2048 }
  0x4a   :  { %p2346_p4 = scmp.ne.s32.totalorder %s3018_s9, %s2345_s3  ;;  %p2349_p5 = scmp.lt.u32.totalorder %s2345_s3, %s3018_s9 }
  0x4c   :  { %p2351_p6 = pnand %p2349_p5, %p2346_p4 }
  0x4e   :  { %2354 = shalt.err (!%p2351_p6)
}
  0x4f   :  { %s2355_s17 = scalar_lea.vmem %s136_s1, 2048  ;;  %p2360_p8 = scmp.lt.s32.totalorder %s136_s1, %s136_s1 }
  0x50   :  { %p2356_p7 = scmp.ne.s32.totalorder %s136_s1, %s2355_s17  ;;  %p2361_p9 = scmp.lt.s32.totalorder %s2355_s17, %s2355_s17 }
  0x52   :  { %p2362_p10 = por %p2361_p9, %p2360_p8 }
  0x54   :  { %p2363_p11 = pnand %p2362_p10, %p2356_p7 }
  0x56   :  { %2366 = shalt.err (!%p2363_p11)
}
  0x57   :  { %141 = dma.hbm_to_vmem [thread:$0]  %s3018_s9, 2048, %s136_s1, [#allocation18], %s2582_s18, %s2582_s18, %s2583_s19  }
  0x58   :  { %s2588_s20 = smov [#allocation20]   ;;  %s2589_s22 = smov [#allocation2]  }
  0x59   :  { %s159_s21 = sshll.u32 %s2588_s20, 4  ;;  %s32_s24 = sshll.u32 %s2589_s22, 4  ;;  %s160_s21 = int_to_ptr.vmem [resolvable:$true] %s159_s21  ;;  %s33_s24 = int_to_ptr.vmem [resolvable:$true] %s32_s24 }
  0x5a   :  { %s2367_s25 = scalar_lea.hbm %s3020_s11, 2048 }
  0x5b   :  { %p2368_p12 = scmp.ne.s32.totalorder %s3020_s11, %s2367_s25  ;;  %p2371_p13 = scmp.lt.u32.totalorder %s2367_s25, %s3020_s11 }
  0x5d   :  { %p2373_p0 = pnand %p2371_p13, %p2368_p12 }
  0x5f   :  { %2376 = shalt.err (!%p2373_p0)
}
  0x60   :  { %s2377_s9 = scalar_lea.vmem %s160_s21, 2048  ;;  %p2382_p2 = scmp.lt.s32.totalorder %s160_s21, %s160_s21 }
  0x61   :  { %p2378_p1 = scmp.ne.s32.totalorder %s160_s21, %s2377_s9  ;;  %p2383_p3 = scmp.lt.s32.totalorder %s2377_s9, %s2377_s9 }
  0x63   :  { %p2384_p4 = por %p2383_p3, %p2382_p2 }
  0x65   :  { %p2385_p5 = pnand %p2384_p4, %p2378_p1 }
  0x67   :  { %2388 = shalt.err (!%p2385_p5)
}
  0x68   :  { %165 = dma.hbm_to_vmem [thread:$0]  %s3020_s11, 2048, %s160_s21, [#allocation21], %s2582_s18, %s2582_s18, %s2583_s19  }
  0x69   :  { %s2389_s26 = scalar_lea.hbm %s3009_s0, 128 }
  0x6a   :  { %p2390_p6 = scmp.ne.s32.totalorder %s3009_s0, %s2389_s26  ;;  %p2393_p7 = scmp.lt.u32.totalorder %s2389_s26, %s3009_s0 }
  0x6c   :  { %p2395_p8 = pnand %p2393_p7, %p2390_p6 }
  0x6e   :  { %2398 = shalt.err (!%p2395_p8)
}
  0x6f   :  { %s2399_s22 = scalar_lea.vmem %s33_s24, 128  ;;  %p2404_p10 = scmp.lt.s32.totalorder %s33_s24, %s33_s24 }
  0x70   :  { %p2400_p9 = scmp.ne.s32.totalorder %s33_s24, %s2399_s22  ;;  %p2405_p11 = scmp.lt.s32.totalorder %s2399_s22, %s2399_s22 }
  0x72   :  { %p2406_p12 = por %p2405_p11, %p2404_p10 }
  0x74   :  { %p2407_p13 = pnand %p2406_p12, %p2400_p9 }
  0x76   :  { %2410 = shalt.err (!%p2407_p13)
}
  0x77   :  { %35 = dma.hbm_to_vmem [thread:$0]  %s3009_s0, 128, %s33_s24, [#allocation3]  }
  0x78   :  { %s2590_s27 = smov [#allocation7]   ;;  %s2591_s25 = smov [#allocation10]  }
  0x79   :  { %s53_s5 = sshll.u32 %s2590_s27, 4  ;;  %s77_s28 = sshll.u32 %s2591_s25, 4  ;;  %s54_s5 = int_to_ptr.vmem [resolvable:$true] %s53_s5  ;;  %s78_s28 = int_to_ptr.vmem [resolvable:$true] %s77_s28 }
  0x7a   :  { %s2411_s3 = scalar_lea.hbm %s3011_s2, 2048 }
  0x7b   :  { %p2412_p0 = scmp.ne.s32.totalorder %s3011_s2, %s2411_s3  ;;  %p2415_p1 = scmp.lt.u32.totalorder %s2411_s3, %s3011_s2 }
  0x7d   :  { %p2417_p2 = pnand %p2415_p1, %p2412_p0 }
  0x7f   :  { %2420 = shalt.err (!%p2417_p2)
}
  0x80   :  { %s2421_s0 = scalar_lea.vmem %s54_s5, 2048  ;;  %p2426_p4 = scmp.lt.s32.totalorder %s54_s5, %s54_s5 }
  0x81   :  { %p2422_p3 = scmp.ne.s32.totalorder %s54_s5, %s2421_s0  ;;  %p2427_p5 = scmp.lt.s32.totalorder %s2421_s0, %s2421_s0 }
  0x83   :  { %p2428_p6 = por %p2427_p5, %p2426_p4 }
  0x85   :  { %p2429_p7 = pnand %p2428_p6, %p2422_p3 }
  0x87   :  { %2432 = shalt.err (!%p2429_p7)
}
  0x88   :  { %59 = dma.hbm_to_vmem [thread:$0]  %s3011_s2, 2048, %s54_s5, [#allocation6], %s2582_s18, %s2582_s18, %s2583_s19  }
  0x89   :  { %s2433_s7 = scalar_lea.hbm %s3013_s4, 2048 }
  0x8a   :  { %p2434_p8 = scmp.ne.s32.totalorder %s3013_s4, %s2433_s7  ;;  %p2437_p9 = scmp.lt.u32.totalorder %s2433_s7, %s3013_s4 }
  0x8c   :  { %p2439_p10 = pnand %p2437_p9, %p2434_p8 }
  0x8e   :  { %2442 = shalt.err (!%p2439_p10)
}
  0x8f   :  { %s2443_s21 = scalar_lea.vmem %s78_s28, 2048  ;;  %p2448_p12 = scmp.lt.s32.totalorder %s78_s28, %s78_s28 }
  0x90   :  { %p2444_p11 = scmp.ne.s32.totalorder %s78_s28, %s2443_s21  ;;  %p2449_p13 = scmp.lt.s32.totalorder %s2443_s21, %s2443_s21 }
  0x92   :  { %p2450_p0 = por %p2449_p13, %p2448_p12 }
  0x94   :  { %p2451_p1 = pnand %p2450_p0, %p2444_p11 }
  0x96   :  { %2454 = shalt.err (!%p2451_p1)
}
  0x97   :  { %83 = dma.hbm_to_vmem [thread:$0]  %s3013_s4, 2048, %s78_s28, [#allocation9], %s2582_s18, %s2582_s18, %s2583_s19  }
  0x98   :  { %s2592_s5 = smov [#allocation13]   ;;  %s2593_s29 = smov [#allocation16]  }
  0x99   :  { %s102_s25 = sshll.u32 %s2592_s5, 4  ;;  %s123_s30 = sshll.u32 %s2593_s29, 4  ;;  %s103_s25 = int_to_ptr.vmem [resolvable:$true] %s102_s25  ;;  %s124_s30 = int_to_ptr.vmem [resolvable:$true] %s123_s30 }
  0x9a   :  { %s2455_s1 = scalar_lea.hbm %s3015_s6, 16 }
  0x9b   :  { %p2456_p2 = scmp.ne.s32.totalorder %s3015_s6, %s2455_s1  ;;  %p2459_p3 = scmp.lt.u32.totalorder %s2455_s1, %s3015_s6 }
  0x9d   :  { %p2461_p4 = pnand %p2459_p3, %p2456_p2 }
  0x9f   :  { %2464 = shalt.err (!%p2461_p4)
}
  0xa0   :  { %s2465_s4 = scalar_lea.vmem %s103_s25, 16  ;;  %s2469_s28 = scalar_lea.vmem %s103_s25, 32 }
  0xa1   :  { %p2466_p5 = scmp.ne.s32.totalorder %s103_s25, %s2465_s4  ;;  %p2470_p6 = scmp.lt.s32.totalorder %s103_s25, %s103_s25 }
  0xa2   :  { %p2471_p7 = scmp.lt.s32.totalorder %s2469_s28, %s2465_s4 }
  0xa4   :  { %p2472_p8 = por %p2471_p7, %p2470_p6 }
  0xa6   :  { %p2473_p9 = pnand %p2472_p8, %p2466_p5 }
  0xa8   :  { %2476 = shalt.err (!%p2473_p9)
}
  0xa9   :  { %105 = dma.hbm_to_vmem [thread:$0]  %s3015_s6, 16, %s103_s25, [#allocation12]  }
  0xaa   :  { %s2477_s15 = scalar_lea.hbm %s3017_s8, 2048 }
  0xab   :  { %p2478_p10 = scmp.ne.s32.totalorder %s3017_s8, %s2477_s15  ;;  %p2481_p11 = scmp.lt.u32.totalorder %s2477_s15, %s3017_s8 }
  0xad   :  { %p2483_p12 = pnand %p2481_p11, %p2478_p10 }
  0xaf   :  { %2486 = shalt.err (!%p2483_p12)
}
  0xb0   :  { %s2487_s2 = scalar_lea.vmem %s124_s30, 2048  ;;  %p2492_p0 = scmp.lt.s32.totalorder %s124_s30, %s124_s30 }
  0xb1   :  { %p2488_p13 = scmp.ne.s32.totalorder %s124_s30, %s2487_s2  ;;  %p2493_p1 = scmp.lt.s32.totalorder %s2487_s2, %s2487_s2 }
  0xb3   :  { %p2494_p2 = por %p2493_p1, %p2492_p0 }
  0xb5   :  { %p2495_p3 = pnand %p2494_p2, %p2488_p13 }
  0xb7   :  { %2498 = shalt.err (!%p2495_p3)
}
  0xb8   :  { %129 = dma.hbm_to_vmem [thread:$0]  %s3017_s8, 2048, %s124_s30, [#allocation15], %s2582_s18, %s2582_s18, %s2583_s19  }
  0xb9   :  { %s2594_s5 = smov [#allocation19]   ;;  %s2595_s29 = smov [#allocation22]  }
  0xba   :  { %s147_s25 = sshll.u32 %s2594_s5, 4  ;;  %s172_s3 = sshll.u32 %s2595_s29, 4  ;;  %s148_s25 = int_to_ptr.vmem [resolvable:$true] %s147_s25  ;;  %s173_s3 = int_to_ptr.vmem [resolvable:$true] %s172_s3 }
  0xbb   :  { %s2499_s23 = scalar_lea.hbm %s3019_s10, 2048 }
  0xbc   :  { %p2500_p4 = scmp.ne.s32.totalorder %s3019_s10, %s2499_s23  ;;  %p2503_p5 = scmp.lt.u32.totalorder %s2499_s23, %s3019_s10 }
  0xbe   :  { %p2505_p6 = pnand %p2503_p5, %p2500_p4 }
  0xc0   :  { %2508 = shalt.err (!%p2505_p6)
}
  0xc1   :  { %s2509_s8 = scalar_lea.vmem %s148_s25, 2048  ;;  %p2514_p8 = scmp.lt.s32.totalorder %s148_s25, %s148_s25 }
  0xc2   :  { %p2510_p7 = scmp.ne.s32.totalorder %s148_s25, %s2509_s8  ;;  %p2515_p9 = scmp.lt.s32.totalorder %s2509_s8, %s2509_s8 }
  0xc4   :  { %p2516_p10 = por %p2515_p9, %p2514_p8 }
  0xc6   :  { %p2517_p11 = pnand %p2516_p10, %p2510_p7 }
  0xc8   :  { %2520 = shalt.err (!%p2517_p11)
}
  0xc9   :  { %153 = dma.hbm_to_vmem [thread:$0]  %s3019_s10, 2048, %s148_s25, [#allocation18], %s2582_s18, %s2582_s18, %s2583_s19  }
  0xca   :  { %s2521_s17 = scalar_lea.hbm %s3021_s12, 16 }
  0xcb   :  { %p2522_p12 = scmp.ne.s32.totalorder %s3021_s12, %s2521_s17  ;;  %p2525_p13 = scmp.lt.u32.totalorder %s2521_s17, %s3021_s12 }
  0xcd   :  { %p2527_p0 = pnand %p2525_p13, %p2522_p12 }
  0xcf   :  { %2530 = shalt.err (!%p2527_p0)
}
  0xd0   :  { %s2531_s11 = scalar_lea.vmem %s173_s3, 16  ;;  %s2535_s21 = scalar_lea.vmem %s173_s3, 32 }
  0xd1   :  { %p2532_p1 = scmp.ne.s32.totalorder %s173_s3, %s2531_s11  ;;  %p2536_p2 = scmp.lt.s32.totalorder %s173_s3, %s173_s3 }
  0xd2   :  { %p2537_p3 = scmp.lt.s32.totalorder %s2535_s21, %s2531_s11 }
  0xd4   :  { %p2538_p4 = por %p2537_p3, %p2536_p2 }
  0xd6   :  { %p2539_p5 = pnand %p2538_p4, %p2532_p1 }
  0xd8   :  { %2542 = shalt.err (!%p2539_p5)
}
  0xd9   :  { %175 = dma.hbm_to_vmem [thread:$0]  %s3021_s12, 16, %s173_s3, [#allocation21]  }
  0xda   :  { %2565 = dma.done.wait [#allocation3], 128  }
  0xdb   :  { %2566 = vsyncadd [#allocation3], 4294967168 }
  0xdc   :  { %2567 = dma.done.wait [#allocation6], 4096  }
  0xdd   :  { %2568 = vsyncadd [#allocation6], 4294963200 }
  0xde   :  { %2569 = dma.done.wait [#allocation9], 4096  }
  0xdf   :  { %2570 = vsyncadd [#allocation9], 4294963200 }
  0xe0   :  { %2571 = dma.done.wait [#allocation12], 2064  }
  0xe1   :  { %2572 = vsyncadd [#allocation12], 4294965232 }
  0xe2   :  { %2573 = dma.done.wait [#allocation15], 4096  }
  0xe3   :  { %2574 = vsyncadd [#allocation15], 4294963200 }
  0xe4   :  { %2575 = dma.done.wait [#allocation18], 4096  }
  0xe5   :  { %2576 = vsyncadd [#allocation18], 4294963200 }
  0xe6   :  { %2577 = dma.done.wait [#allocation21], 2064  }
  0xe7   :  { %2578 = vsyncadd [#allocation21], 4294965232  ;;  %v2596_v0 = vmov 0.0|0.0   ;;  %vm2597_vm0 = vmmov 0   ;;  %v2598_v1 = vmov 0.0   ;;  %v219_v2 = vld [vmem:[#allocation5] sm:$0xff] }
  0xe8   :  { %1986 = vmatprep.subr.bf16.mxu0 %v2596_v0  ;;  %2010 = vmatprep.subr.bf16.mxu1 %v2596_v0  ;;  %v220_v3 = vld [vmem:[#allocation5 + $0x8] sm:$0xff]  ;;  %v306_v4 = vld [vmem:[#allocation7] sm:$0xff]  ;;  %v221_v7 = vld [vmem:[#allocation5 + $0x10] sm:$0xff]  ;;  %vm549_vm2 = vcmask 64512   ;;  %s2599_s12 = smov [#allocation23]  }
  0xe9   :  { %1648 = vmatprep.mubr.msk.f32.mxu0 %vm2597_vm0, %v2598_v1  ;;  %1683 = vmatprep.mubr.msk.f32.mxu1 %vm2597_vm0, %v2598_v1  ;;  %v1987_v5 = vpack.c.bf16 %v220_v3, %v219_v2  ;;  %v307_v6 = vld [vmem:[#allocation7 + $0x8] sm:$0xff]  ;;  %v222_v8 = vld [vmem:[#allocation5 + $0x18] sm:$0xff]  ;;  %v308_v10 = vld [vmem:[#allocation7 + $0x10] sm:$0xff]  ;;  %s1419_s19 = sshll.u32 %s2599_s12, 4  ;;  %s1420_s19 = int_to_ptr.vmem [resolvable:$true] %s1419_s19 }
  0xea   :  { %v2011_v9 = vpack.c.bf16 %v307_v6, %v306_v4  ;;  %v309_v11 = vld [vmem:[#allocation7 + $0x18] sm:$0xff]  ;;  %v1990_v12 = vpack.c.bf16 %v222_v8, %v221_v7  ;;  %v223_v14 = vld [vmem:[#allocation5 + $0x20] sm:$0xff]  ;;  %v224_v15 = vld [vmem:[#allocation5 + $0x28] sm:$0xff]  ;;  %s2543_s2 = scalar_lea.vmem %s1420_s19, 128  ;;  %p2548_p7 = scmp.lt.s32.totalorder %s1420_s19, %s1420_s19 }
  0xeb   :  { %1988 = vmatpush3.bf16.msra.mxu0 %v1987_v5  ;;  %v2014_v13 = vpack.c.bf16 %v309_v11, %v308_v10  ;;  %v310_v16 = vld [vmem:[#allocation7 + $0x20] sm:$0xff]  ;;  %v311_v17 = vld [vmem:[#allocation7 + $0x28] sm:$0xff]  ;;  %v1993_v18 = vpack.c.bf16 %v224_v15, %v223_v14  ;;  %v225_v20 = vld [vmem:[#allocation5 + $0x30] sm:$0xff]  ;;  %p2544_p6 = scmp.ne.s32.totalorder %s1420_s19, %s2543_s2  ;;  %p2549_p8 = scmp.lt.s32.totalorder %s2543_s2, %s2543_s2 }
  0xec   :  { %2012 = vmatpush3.bf16.msra.mxu1 %v2011_v9  ;;  %1989 = vmatprep.subr.bf16.mxu0 %v2596_v0  ;;  %v2017_v19 = vpack.c.bf16 %v311_v17, %v310_v16  ;;  %v226_v21 = vld [vmem:[#allocation5 + $0x38] sm:$0xff]  ;;  %v312_v22 = vld [vmem:[#allocation7 + $0x30] sm:$0xff]  ;;  %v227_v26 = vld [vmem:[#allocation5 + $0x40] sm:$0xff] }
  0xed   :  { %2013 = vmatprep.subr.bf16.mxu1 %v2596_v0  ;;  %v313_v23 = vld [vmem:[#allocation7 + $0x38] sm:$0xff]  ;;  %v1996_v24 = vpack.c.bf16 %v226_v21, %v225_v20  ;;  %v228_v27 = vld [vmem:[#allocation5 + $0x48] sm:$0xff]  ;;  %v314_v28 = vld [vmem:[#allocation7 + $0x40] sm:$0xff]  ;;  %p2550_p9 = por %p2549_p8, %p2548_p7 }
  0xee   :  { %v2020_v25 = vpack.c.bf16 %v313_v23, %v312_v22  ;;  %v315_v29 = vld [vmem:[#allocation7 + $0x48] sm:$0xff]  ;;  %v1999_v30 = vpack.c.bf16 %v228_v27, %v227_v26  ;;  %v229_v32 = vld [vmem:[#allocation5 + $0x50] sm:$0xff]  ;;  %v230_v33 = vld [vmem:[#allocation5 + $0x58] sm:$0xff] }
  0xef   :  { %1991 = vmatpush3.bf16.msra.mxu0 %v1990_v12  ;;  %v2023_v31 = vpack.c.bf16 %v315_v29, %v314_v28  ;;  %v316_v34 = vld [vmem:[#allocation7 + $0x50] sm:$0xff]  ;;  %v317_v35 = vld [vmem:[#allocation7 + $0x58] sm:$0xff]  ;;  %v2002_v36 = vpack.c.bf16 %v230_v33, %v229_v32  ;;  %v231_v38 = vld [vmem:[#allocation5 + $0x60] sm:$0xff]  ;;  %p2551_p10 = pnand %p2550_p9, %p2544_p6 }
  0xf0   :  { %2015 = vmatpush3.bf16.msra.mxu1 %v2014_v13  ;;  %1992 = vmatprep.subr.bf16.mxu0 %v2596_v0  ;;  %v2026_v37 = vpack.c.bf16 %v317_v35, %v316_v34  ;;  %v232_v39 = vld [vmem:[#allocation5 + $0x68] sm:$0xff]  ;;  %v318_v40 = vld [vmem:[#allocation7 + $0x60] sm:$0xff]  ;;  %v233_v44 = vld [vmem:[#allocation5 + $0x70] sm:$0xff] }
  0xf1   :  { %2016 = vmatprep.subr.bf16.mxu1 %v2596_v0  ;;  %v319_v41 = vld [vmem:[#allocation7 + $0x68] sm:$0xff]  ;;  %v2005_v42 = vpack.c.bf16 %v232_v39, %v231_v38  ;;  %v234_v45 = vld [vmem:[#allocation5 + $0x78] sm:$0xff]  ;;  %v320_v46 = vld [vmem:[#allocation7 + $0x70] sm:$0xff] }
  0xf2   :  { %v2029_v43 = vpack.c.bf16 %v319_v41, %v318_v40  ;;  %v321_v47 = vld [vmem:[#allocation7 + $0x78] sm:$0xff]  ;;  %v2008_v48 = vpack.c.bf16 %v234_v45, %v233_v44  ;;  %v392_v56 = vld [vmem:[#allocation8] sm:$0xff]  ;;  %v393_v57 = vld [vmem:[#allocation8 + $0x8] sm:$0xff] }
  0xf3   :  { %1994 = vmatpush3.bf16.msra.mxu0 %v1993_v18  ;;  %v2032_v49 = vpack.c.bf16 %v321_v47, %v320_v46  ;;  %v2876_v50 = vld [vmem:[#allocation2] sm:$0xff]  ;;  %v394_v58 = vld [vmem:[#allocation8 + $0x10] sm:$0xff]  ;;  %v2035_v59 = vpack.c.bf16 %v393_v57, %v392_v56  ;;  %v396_v62 = vld [vmem:[#allocation8 + $0x20] sm:$0xff]  ;;  %v215_v18 = vlaneseq }
  0xf4   :  { %2018 = vmatpush3.bf16.msra.mxu1 %v2017_v19  ;;  %1995 = vmatprep.subr.bf16.mxu0 %v2596_v0  ;;  %v395_v60 = vld [vmem:[#allocation8 + $0x18] sm:$0xff]  ;;  %v397_v63 = vld [vmem:[#allocation8 + $0x28] sm:$0xff]  ;;  %v398_v3 = vld [vmem:[#allocation8 + $0x30] sm:$0xff] }
  0xf5   :  { %2019 = vmatprep.subr.bf16.mxu1 %v2596_v0  ;;  %v2038_v61 = vpack.c.bf16 %v395_v60, %v394_v58  ;;  %v2041_v2 = vpack.c.bf16 %v397_v63, %v396_v62  ;;  %v399_v4 = vld [vmem:[#allocation8 + $0x38] sm:$0xff]  ;;  %v400_v6 = vld [vmem:[#allocation8 + $0x40] sm:$0xff]  ;;  %v401_v7 = vld [vmem:[#allocation8 + $0x48] sm:$0xff]  ;;  %v2900_v19 = vand.u32 127, %v215_v18 }
  0xf6   :  { %v2044_v5 = vpack.c.bf16 %v399_v4, %v398_v3  ;;  %v2047_v8 = vpack.c.bf16 %v401_v7, %v400_v6  ;;  %v402_v9 = vld [vmem:[#allocation8 + $0x50] sm:$0xff]  ;;  %v403_v10 = vld [vmem:[#allocation8 + $0x58] sm:$0xff]  ;;  %v404_v12 = vld [vmem:[#allocation8 + $0x60] sm:$0xff] }
  0xf7   :  { %1997 = vmatpush3.bf16.msra.mxu0 %v1996_v24  ;;  %v2050_v11 = vpack.c.bf16 %v403_v10, %v402_v9  ;;  %v405_v13 = vld [vmem:[#allocation8 + $0x68] sm:$0xff]  ;;  %v406_v15 = vld [vmem:[#allocation8 + $0x70] sm:$0xff]  ;;  %v407_v16 = vld [vmem:[#allocation8 + $0x78] sm:$0xff]  ;;  %vm217_vm1 = vcmp.lt.s32.totalorder %v2900_v19, 8 }
  0xf8   :  { %2021 = vmatpush3.bf16.msra.mxu1 %v2020_v25  ;;  %1998 = vmatprep.subr.bf16.mxu0 %v2596_v0  ;;  %v2053_v14 = vpack.c.bf16 %v405_v13, %v404_v12  ;;  %v2056_v17 = vpack.c.bf16 %v407_v16, %v406_v15  ;;  %v634_v32 = vld [vmem:[#allocation10] sm:$0xff]  ;;  %v635_v33 = vld [vmem:[#allocation10 + $0x8] sm:$0xff]  ;;  %v637_v38 = vld [vmem:[#allocation10 + $0x18] sm:$0xff] }
  0xf9   :  { %2022 = vmatprep.subr.bf16.mxu1 %v2596_v0  ;;  %v2059_v35 = vpack.c.bf16 %v635_v33, %v634_v32  ;;  %v638_v40 = vld [vmem:[#allocation10 + $0x20] sm:$0xff]  ;;  %v639_v41 = vld [vmem:[#allocation10 + $0x28] sm:$0xff]  ;;  %v641_v44 = vld [vmem:[#allocation10 + $0x38] sm:$0xff] }
  0xfa   :  { %v642_v46 = vld [vmem:[#allocation10 + $0x40] sm:$0xff]  ;;  %v643_v47 = vld [vmem:[#allocation10 + $0x48] sm:$0xff]  ;;  %v648_v56 = vld [vmem:[#allocation10 + $0x70] sm:$0xff] }
  0xfb   :  { %2000 = vmatpush3.bf16.msra.mxu0 %v1999_v30  ;;  %v649_v57 = vld [vmem:[#allocation10 + $0x78] sm:$0xff]  ;;  %v722_v60 = vld [vmem:[#allocation11 + $0x8] sm:$0xff]  ;;  %v725_v3 = vld [vmem:[#allocation11 + $0x20] sm:$0xff] }
  0xfc   :  { %2024 = vmatpush3.bf16.msra.mxu1 %v2023_v31  ;;  %2001 = vmatprep.subr.bf16.mxu0 %v2596_v0  ;;  %v2080_v58 = vpack.c.bf16 %v649_v57, %v648_v56  ;;  %v724_v63 = vld [vmem:[#allocation11 + $0x18] sm:$0xff]  ;;  %v726_v4 = vld [vmem:[#allocation11 + $0x28] sm:$0xff]  ;;  %v727_v6 = vld [vmem:[#allocation11 + $0x30] sm:$0xff] }
  0xfd   :  { %2025 = vmatprep.subr.bf16.mxu1 %v2596_v0  ;;  %v728_v7 = vld [vmem:[#allocation11 + $0x38] sm:$0xff]  ;;  %v729_v9 = vld [vmem:[#allocation11 + $0x40] sm:$0xff]  ;;  %v730_v10 = vld [vmem:[#allocation11 + $0x48] sm:$0xff] }
  0xfe   :  { %v731_v12 = vld [vmem:[#allocation11 + $0x50] sm:$0xff]  ;;  %v732_v13 = vld [vmem:[#allocation11 + $0x58] sm:$0xff]  ;;  %v733_v15 = vld [vmem:[#allocation11 + $0x60] sm:$0xff] }
  0xff   :  { %2003 = vmatpush3.bf16.msra.mxu0 %v2002_v36  ;;  %v734_v16 = vld [vmem:[#allocation11 + $0x68] sm:$0xff]  ;;  %v822_v33 = vld [vmem:[#allocation14 + $0x30] sm:$0xff] }
 0x100   :  { %2027 = vmatpush3.bf16.msra.mxu1 %v2026_v37  ;;  %2004 = vmatprep.subr.bf16.mxu0 %v2596_v0  ;;  %v636_v37 = vld [vmem:[#allocation10 + $0x10] sm:$0xff] }
 0x101   :  { %2028 = vmatprep.subr.bf16.mxu1 %v2596_v0  ;;  %v2062_v39 = vpack.c.bf16 %v637_v38, %v636_v37  ;;  %v904_v37 = vld [vmem:[#allocation16 + $0x8] sm:$0xff]  ;;  %v826_v57 = vld [vmem:[#allocation14 + $0x50] sm:$0xff] }
 0x103   :  { %2006 = vmatpush3.bf16.msra.mxu0 %v2005_v42  ;;  %v2065_v42 = vpack.c.bf16 %v639_v41, %v638_v40 }
 0x104   :  { %2030 = vmatpush3.bf16.msra.mxu1 %v2029_v43  ;;  %2007 = vmatprep.subr.bf16.mxu0 %v2596_v0  ;;  %v640_v43 = vld [vmem:[#allocation10 + $0x30] sm:$0xff] }
 0x105   :  { %2031 = vmatprep.subr.bf16.mxu1 %v2596_v0  ;;  %v2068_v45 = vpack.c.bf16 %v641_v44, %v640_v43  ;;  %v906_v43 = vld [vmem:[#allocation16 + $0x18] sm:$0xff] }
 0x107   :  { %2009 = vmatpush3.bf16.msra.mxu0 %v2008_v48  ;;  %v2071_v48 = vpack.c.bf16 %v643_v47, %v642_v46  ;;  %v908_v46 = vld [vmem:[#allocation16 + $0x28] sm:$0xff] }
 0x108   :  { %2033 = vmatpush3.bf16.msra.mxu1 %v2032_v49  ;;  %2034 = vmatprep.subr.bf16.mxu0 %v2596_v0  ;;  %v644_v49 = vld [vmem:[#allocation10 + $0x50] sm:$0xff] }
 0x109   :  { %1721 = vmatprep.subr.mxu1 %v2598_v1 }
 0x10a   :  { %1649 = vmatmul.mubr.f32.vlgmr.msra.gmra.mrb[0].mxu0 %v2876_v50 }
 0x10b   :  { %1684 = vmatmul.mubr.f32.vlgmr.msra.gmra.mrb[0].mxu1 %v2876_v50  ;;  %1718 = vmatprep.mubr.msk.f32.mxu0 %vm2597_vm0, %v2598_v1 }
 0x10c   :  { %1723 = vmatprep.mubr.msk.f32.mxu1 %vm2597_vm0, %v2598_v1  ;;  %2036 = vmatpush3.bf16.msra.mxu0 %v2035_v59  ;;  %v721_v59 = vld [vmem:[#allocation11] sm:$0xff] }
 0x10d   :  { %2037 = vmatprep.subr.bf16.mxu0 %v2596_v0  ;;  %v2083_v62 = vpack.c.bf16 %v722_v60, %v721_v59  ;;  %v913_v60 = vld [vmem:[#allocation16 + $0x50] sm:$0xff] }
 0x110   :  { %2039 = vmatpush3.bf16.msra.mxu0 %v2038_v61  ;;  %v723_v61 = vld [vmem:[#allocation11 + $0x10] sm:$0xff] }
 0x111   :  { %2040 = vmatprep.subr.bf16.mxu0 %v2596_v0 }
 0x114   :  { %2042 = vmatpush3.bf16.msra.mxu0 %v2041_v2  ;;  %v2086_v2 = vpack.c.bf16 %v724_v63, %v723_v61  ;;  %v914_v61 = vld [vmem:[#allocation16 + $0x58] sm:$0xff]  ;;  %v828_v63 = vld [vmem:[#allocation14 + $0x60] sm:$0xff] }
 0x115   :  { %2043 = vmatprep.subr.bf16.mxu0 %v2596_v0 }
 0x118   :  { %2045 = vmatpush3.bf16.msra.mxu0 %v2044_v5  ;;  %v2089_v5 = vpack.c.bf16 %v726_v4, %v725_v3  ;;  %v915_v3 = vld [vmem:[#allocation16 + $0x60] sm:$0xff] }
 0x119   :  { %2046 = vmatprep.subr.bf16.mxu0 %v2596_v0 }
 0x11c   :  { %2048 = vmatpush3.bf16.msra.mxu0 %v2047_v8  ;;  %v2092_v8 = vpack.c.bf16 %v728_v7, %v727_v6  ;;  %v830_v7 = vld [vmem:[#allocation14 + $0x70] sm:$0xff] }
 0x11d   :  { %2049 = vmatprep.subr.bf16.mxu0 %v2596_v0 }
 0x120   :  { %2051 = vmatpush3.bf16.msra.mxu0 %v2050_v11  ;;  %v2095_v11 = vpack.c.bf16 %v730_v10, %v729_v9  ;;  %v917_v9 = vld [vmem:[#allocation16 + $0x70] sm:$0xff]  ;;  %v918_v10 = vld [vmem:[#allocation16 + $0x78] sm:$0xff] }
 0x121   :  { %2052 = vmatprep.subr.bf16.mxu0 %v2596_v0 }
 0x124   :  { %2054 = vmatpush3.bf16.msra.mxu0 %v2053_v14  ;;  %v2098_v14 = vpack.c.bf16 %v732_v13, %v731_v12  ;;  %v2152_v12 = vpack.c.bf16 %v918_v10, %v917_v9  ;;  %v1435_v13 = vld [vmem:[#allocation13] ss:$0 sm:$0xff]  ;;  %v1236_v9 = vld [vmem:[#allocation19 + $0x30] sm:$0xff] }
 0x125   :  { %2055 = vmatprep.subr.bf16.mxu0 %v2596_v0  ;;  %v1237_v10 = vld [vmem:[#allocation19 + $0x38] sm:$0xff] }
 0x128   :  { %2057 = vmatpush3.bf16.msra.mxu0 %v2056_v17  ;;  %v2101_v17 = vpack.c.bf16 %v734_v16, %v733_v15 }
 0x129   :  { %2082 = vmatprep.subr.bf16.mxu0 %v2596_v0 }
 0x12b   :  { %1719 = vmatmul.mubr.f32.vlgmr.msra.gmra.mrb[2].mxu0 %v2876_v50 }
 0x12c   :  { %1798 = vmatprep.mubr.msk.f32.mxu0 %vm2597_vm0, %v2598_v1  ;;  %2084 = vmatpush3.bf16.msra.mxu0 %v2083_v62  ;;  %v2146_v62 = vpack.c.bf16 %v914_v61, %v913_v60  ;;  %v1230_v61 = vld [vmem:[#allocation19] sm:$0xff] }
 0x12d   :  { %2085 = vmatprep.subr.bf16.mxu0 %v2596_v0 }
 0x130   :  { %2087 = vmatpush3.bf16.msra.mxu0 %v2086_v2  ;;  %v829_v2 = vld [vmem:[#allocation14 + $0x68] sm:$0xff] }
 0x131   :  { %2088 = vmatprep.subr.bf16.mxu0 %v2596_v0  ;;  %v2125_v4 = vpack.c.bf16 %v829_v2, %v828_v63 }
 0x134   :  { %2090 = vmatpush3.bf16.msra.mxu0 %v2089_v5  ;;  %v916_v5 = vld [vmem:[#allocation16 + $0x68] sm:$0xff] }
 0x135   :  { %2091 = vmatprep.subr.bf16.mxu0 %v2596_v0  ;;  %v2149_v6 = vpack.c.bf16 %v916_v5, %v915_v3  ;;  %v1232_v3 = vld [vmem:[#allocation19 + $0x10] sm:$0xff] }
 0x138   :  { %2093 = vmatpush3.bf16.msra.mxu0 %v2092_v8  ;;  %v831_v8 = vld [vmem:[#allocation14 + $0x78] sm:$0xff] }
 0x139   :  { %2094 = vmatprep.subr.bf16.mxu0 %v2596_v0 }
 0x13c   :  { %2096 = vmatpush3.bf16.msra.mxu0 %v2095_v11  ;;  %v2128_v11 = vpack.c.bf16 %v831_v8, %v830_v7  ;;  %v1235_v7 = vld [vmem:[#allocation19 + $0x28] sm:$0xff] }
 0x13d   :  { %2097 = vmatprep.subr.bf16.mxu0 %v2596_v0 }
 0x140   :  { %2099 = vmatpush3.bf16.msra.mxu0 %v2098_v14 }
 0x141   :  { %2100 = vmatprep.subr.bf16.mxu0 %v2596_v0 }
 0x144   :  { %2102 = vmatpush3.bf16.msra.mxu0 %v2101_v17  ;;  %v989_v17 = vld [vmem:[#allocation17] sm:$0xff] }
 0x145   :  { %2103 = vmatprep.subr.bf16.mxu0 %v2596_v0 }
 0x1dd   :  { %v301_v51 = vpop.f32.mrb[0].mxu0 }
 0x1de   :  { %v305_v52 = vmul.f32 0.17677669, %v301_v51  ;;  %v388_v53 = vpop.f32.mrb[0].mxu1  ;;  %v1650_v54 = vpop.f32.mrb[1].mxu0  ;;  %v645_v51 = vld [vmem:[#allocation10 + $0x58] sm:$0xff] }
 0x1df   :  { %v1685_v55 = vpop.f32.mrb[1].mxu1  ;;  %1722 = vmatpush3.xpose.msra.mxu1 %v388_v53  ;;  %v646_v53 = vld [vmem:[#allocation10 + $0x60] sm:$0xff]  ;;  %v647_v54 = vld [vmem:[#allocation10 + $0x68] sm:$0xff] }
 0x1e0   :  { %1726 = vmatprep.subr.mxu1 %v2598_v1  ;;  %v2077_v55 = vpack.c.bf16 %v647_v54, %v646_v53  ;;  %v911_v54 = vld [vmem:[#allocation16 + $0x40] sm:$0xff] }
 0x1e2   :  { %1724 = vmatmul.mubr.f32.vlgmr.msra.gmra.mrb[2].mxu1 %v305_v52  ;;  %v2074_v52 = vpack.c.bf16 %v645_v51, %v644_v49  ;;  %v824_v51 = vld [vmem:[#allocation14 + $0x40] sm:$0xff] }
 0x1e3   :  { %1728 = vmatprep.mubr.msk.f32.mxu1 %vm2597_vm0, %v2598_v1 }
 0x1fe   :  { %v474_v29 = vpop.f32.mrb[2].mxu0 }
 0x1ff   :  { %v1720_v30 = vpop.f32.mrb[3].mxu0  ;;  %1727 = vmatpush3.msra.mxu1 %v474_v29 }
 0x200   :  { %2058 = vmatprep.subr.bf16.mxu1 %v2596_v0  ;;  %v820_v30 = vld [vmem:[#allocation14 + $0x20] sm:$0xff] }
 0x2b5   :  { %v544_v20 = vpop.f32.mrb[2].mxu1 }
 0x2b6   :  { %v548_v21 = vsel %vm217_vm1, %v544_v20, -1e+30  ;;  %v1725_v22 = vpop.f32.mrb[3].mxu1 }
 0x2b7   :  { %v550_v23 = vsel %vm549_vm2, %v548_v21, -inf  ;;  %v736_v22 = vld [vmem:[#allocation11 + $0x78] sm:$0xff] }
 0x2b8   :  { %551 = vmax.xlane.f32.xlu0 %v550_v23 }
 0x345   :  { %v552_v24 = vpop.xlane.xlu0 %551 }
 0x346   :  { %v553_v25 = vsub.f32 %v548_v21, %v552_v24  ;;  %v735_v21 = vld [vmem:[#allocation11 + $0x70] sm:$0xff]  ;;  %v816_v24 = vld [vmem:[#allocation14] sm:$0xff] }
 0x347   :  { %v2104_v23 = vpack.c.bf16 %v736_v22, %v735_v21 }
 0x348   :  { %v554_v26 = vmul.f32 1.442695, %v553_v25  ;;  %v817_v25 = vld [vmem:[#allocation14 + $0x8] sm:$0xff] }
 0x349   :  { %2105 = vmatpush3.bf16.msra.mxu0 %v2104_v23  ;;  %v991_v23 = vld [vmem:[#allocation17 + $0x10] sm:$0xff] }
 0x34a   :  { %2245 = vpow2.f32 %v554_v26  ;;  %2130 = vmatprep.subr.bf16.mxu0 %v2596_v0  ;;  %v2107_v26 = vpack.c.bf16 %v817_v25, %v816_v24  ;;  %v992_v24 = vld [vmem:[#allocation17 + $0x18] sm:$0xff] }
 0x34b   :  { %v2158_v25 = vpack.c.bf16 %v992_v24, %v991_v23  ;;  %v1245_v23 = vld [vmem:[#allocation19 + $0x78] sm:$0xff] }
 0x354   :  { %v2246_v27 = vpop.eup %2245 }
 0x355   :  { %v556_v28 = vsel %vm549_vm2, %v2246_v27, 0.0 }
 0x356   :  { %557 = vadd.xlane.f32.xlu0 %v556_v28  ;;  %v819_v28 = vld [vmem:[#allocation14 + $0x18] sm:$0xff] }
 0x3e3   :  { %v558_v31 = vpop.xlane.xlu0 %557 }
 0x3e4   :  { %2247 = vrcp.f32 %v558_v31  ;;  %v821_v31 = vld [vmem:[#allocation14 + $0x28] sm:$0xff] }
 0x3e5   :  { %v2113_v32 = vpack.c.bf16 %v821_v31, %v820_v30  ;;  %v996_v30 = vld [vmem:[#allocation17 + $0x38] sm:$0xff] }
 0x3ee   :  { %v2248_v34 = vpop.eup %2247 }
 0x3ef   :  { %v560_v36 = vmul.f32 %v2248_v34, %v2246_v27  ;;  %v818_v27 = vld [vmem:[#allocation14 + $0x10] sm:$0xff]  ;;  %v823_v34 = vld [vmem:[#allocation14 + $0x38] sm:$0xff] }
 0x3f0   :  { %v2110_v29 = vpack.c.bf16 %v819_v28, %v818_v27  ;;  %v994_v27 = vld [vmem:[#allocation17 + $0x28] sm:$0xff] }
 0x3f1   :  { %1729 = vmatmul.mubr.msk.f32.vlgmr.msra.gmra.mrb[4].mxu1 %vm549_vm2, %v560_v36  ;;  %v903_v36 = vld [vmem:[#allocation16] sm:$0xff] }
 0x3f2   :  { %2060 = vmatpush3.bf16.msra.mxu1 %v2059_v35  ;;  %1763 = vmatprep.mubr.msk.f32.mxu1 %vm2597_vm0, %v2598_v1  ;;  %v2116_v35 = vpack.c.bf16 %v823_v34, %v822_v33  ;;  %v998_v33 = vld [vmem:[#allocation17 + $0x48] sm:$0xff] }
 0x3f3   :  { %2061 = vmatprep.subr.bf16.mxu1 %v2596_v0 }
 0x3f6   :  { %2063 = vmatpush3.bf16.msra.mxu1 %v2062_v39  ;;  %v2131_v39 = vpack.c.bf16 %v904_v37, %v903_v36  ;;  %v1000_v36 = vld [vmem:[#allocation17 + $0x58] sm:$0xff] }
 0x3f7   :  { %2064 = vmatprep.subr.bf16.mxu1 %v2596_v0 }
 0x3fa   :  { %2066 = vmatpush3.bf16.msra.mxu1 %v2065_v42  ;;  %v905_v42 = vld [vmem:[#allocation16 + $0x10] sm:$0xff] }
 0x3fb   :  { %2067 = vmatprep.subr.bf16.mxu1 %v2596_v0  ;;  %v2134_v44 = vpack.c.bf16 %v906_v43, %v905_v42  ;;  %v1004_v42 = vld [vmem:[#allocation17 + $0x78] sm:$0xff] }
 0x3fe   :  { %2069 = vmatpush3.bf16.msra.mxu1 %v2068_v45  ;;  %v907_v45 = vld [vmem:[#allocation16 + $0x20] sm:$0xff] }
 0x3ff   :  { %2070 = vmatprep.subr.bf16.mxu1 %v2596_v0  ;;  %v2137_v47 = vpack.c.bf16 %v908_v46, %v907_v45 }
 0x402   :  { %2072 = vmatpush3.bf16.msra.mxu1 %v2071_v48  ;;  %v910_v48 = vld [vmem:[#allocation16 + $0x38] sm:$0xff] }
 0x403   :  { %2073 = vmatprep.subr.bf16.mxu1 %v2596_v0 }
 0x406   :  { %2075 = vmatpush3.bf16.msra.mxu1 %v2074_v52  ;;  %v825_v52 = vld [vmem:[#allocation14 + $0x48] sm:$0xff] }
 0x407   :  { %2076 = vmatprep.subr.bf16.mxu1 %v2596_v0  ;;  %v2119_v53 = vpack.c.bf16 %v825_v52, %v824_v51 }
 0x40a   :  { %2078 = vmatpush3.bf16.msra.mxu1 %v2077_v55  ;;  %v912_v55 = vld [vmem:[#allocation16 + $0x48] sm:$0xff] }
 0x40b   :  { %2079 = vmatprep.subr.bf16.mxu1 %v2596_v0  ;;  %v2143_v56 = vpack.c.bf16 %v912_v55, %v911_v54 }
 0x40e   :  { %2081 = vmatpush3.bf16.msra.mxu1 %v2080_v58  ;;  %v827_v58 = vld [vmem:[#allocation14 + $0x58] sm:$0xff] }
 0x40f   :  { %2106 = vmatprep.subr.bf16.mxu1 %v2596_v0  ;;  %v2122_v59 = vpack.c.bf16 %v827_v58, %v826_v57 }
 0x4c4   :  { %v630_v18 = vpop.f32.mrb[4].mxu1 }
 0x4c5   :  { %v1730_v20 = vpop.f32.mrb[5].mxu1  ;;  %1764 = vmatmul.mubr.f32.vlgmr.msra.gmra.mrb[6].mxu1 %v630_v18  ;;  %v990_v18 = vld [vmem:[#allocation17 + $0x8] sm:$0xff] }
 0x4c6   :  { %1833 = vmatprep.mubr.msk.f32.mxu1 %vm2597_vm0, %v2598_v1  ;;  %2108 = vmatpush3.bf16.msra.mxu1 %v2107_v26  ;;  %v2155_v21 = vpack.c.bf16 %v990_v18, %v989_v17  ;;  %v993_v26 = vld [vmem:[#allocation17 + $0x20] sm:$0xff]  ;;  %v1243_v18 = vld [vmem:[#allocation19 + $0x68] sm:$0xff] }
 0x4c7   :  { %2109 = vmatprep.subr.bf16.mxu1 %v2596_v0  ;;  %v2161_v28 = vpack.c.bf16 %v994_v27, %v993_v26  ;;  %v1242_v17 = vld [vmem:[#allocation19 + $0x60] sm:$0xff]  ;;  %v1318_v26 = vld [vmem:[#allocation20 + $0x8] sm:$0xff]  ;;  %v1319_v27 = vld [vmem:[#allocation20 + $0x10] sm:$0xff] }
 0x4ca   :  { %2111 = vmatpush3.bf16.msra.mxu1 %v2110_v29  ;;  %v995_v29 = vld [vmem:[#allocation17 + $0x30] sm:$0xff] }
 0x4cb   :  { %2112 = vmatprep.subr.bf16.mxu1 %v2596_v0  ;;  %v2164_v31 = vpack.c.bf16 %v996_v30, %v995_v29  ;;  %v1320_v29 = vld [vmem:[#allocation20 + $0x18] sm:$0xff] }
 0x4cc   :  { %v2206_v30 = vpack.c.bf16 %v1320_v29, %v1319_v27 }
 0x4ce   :  { %2114 = vmatpush3.bf16.msra.mxu1 %v2113_v32  ;;  %v997_v32 = vld [vmem:[#allocation17 + $0x40] sm:$0xff] }
 0x4cf   :  { %2115 = vmatprep.subr.bf16.mxu1 %v2596_v0  ;;  %v2167_v34 = vpack.c.bf16 %v998_v33, %v997_v32  ;;  %v1322_v32 = vld [vmem:[#allocation20 + $0x28] sm:$0xff] }
 0x4d2   :  { %2117 = vmatpush3.bf16.msra.mxu1 %v2116_v35  ;;  %v999_v35 = vld [vmem:[#allocation17 + $0x50] sm:$0xff] }
 0x4d3   :  { %2118 = vmatprep.subr.bf16.mxu1 %v2596_v0  ;;  %v2170_v37 = vpack.c.bf16 %v1000_v36, %v999_v35  ;;  %v1324_v35 = vld [vmem:[#allocation20 + $0x38] sm:$0xff] }
 0x4d6   :  { %2120 = vmatpush3.bf16.msra.mxu1 %v2119_v53 }
 0x4d7   :  { %2121 = vmatprep.subr.bf16.mxu1 %v2596_v0 }
 0x4da   :  { %2123 = vmatpush3.bf16.msra.mxu1 %v2122_v59 }
 0x4db   :  { %2124 = vmatprep.subr.bf16.mxu1 %v2596_v0 }
 0x4de   :  { %2126 = vmatpush3.bf16.msra.mxu1 %v2125_v4  ;;  %v1233_v4 = vld [vmem:[#allocation19 + $0x18] sm:$0xff] }
 0x4df   :  { %2127 = vmatprep.subr.bf16.mxu1 %v2596_v0  ;;  %v2182_v5 = vpack.c.bf16 %v1233_v4, %v1232_v3 }
 0x4e2   :  { %2129 = vmatpush3.bf16.msra.mxu1 %v2128_v11  ;;  %v2188_v11 = vpack.c.bf16 %v1237_v10, %v1236_v9 }
 0x4e3   :  { %2154 = vmatprep.subr.bf16.mxu1 %v2596_v0 }
 0x598   :  { %v716_v38 = vpop.f32.mrb[6].mxu1 }
 0x599   :  { %v2934_v40 = vadd.f32 %v716_v38, %v2876_v50  ;;  %v1765_v41 = vpop.f32.mrb[7].mxu1  ;;  %v909_v50 = vld [vmem:[#allocation16 + $0x30] sm:$0xff]  ;;  %v1001_v38 = vld [vmem:[#allocation17 + $0x60] sm:$0xff] }
 0x59a   :  { %v2140_v49 = vpack.c.bf16 %v910_v48, %v909_v50  ;;  %v1003_v41 = vld [vmem:[#allocation17 + $0x70] sm:$0xff] }
 0x59b   :  { %1799 = vmatmul.mubr.f32.vlgmr.msra.gmra.mrb[4].mxu0 %v2934_v40  ;;  %v2176_v43 = vpack.c.bf16 %v1004_v42, %v1003_v41  ;;  %v1328_v41 = vld [vmem:[#allocation20 + $0x58] sm:$0xff] }
 0x59c   :  { %2132 = vmatpush3.bf16.msra.mxu0 %v2131_v39  ;;  %1868 = vmatprep.mubr.msk.f32.mxu0 %vm2597_vm0, %v2598_v1  ;;  %v1002_v39 = vld [vmem:[#allocation17 + $0x68] sm:$0xff] }
 0x59d   :  { %2133 = vmatprep.subr.bf16.mxu0 %v2596_v0 }
 0x5a0   :  { %2135 = vmatpush3.bf16.msra.mxu0 %v2134_v44 }
 0x5a1   :  { %2136 = vmatprep.subr.bf16.mxu0 %v2596_v0 }
 0x5a4   :  { %2138 = vmatpush3.bf16.msra.mxu0 %v2137_v47 }
 0x5a5   :  { %2139 = vmatprep.subr.bf16.mxu0 %v2596_v0 }
 0x5a8   :  { %2141 = vmatpush3.bf16.msra.mxu0 %v2140_v49 }
 0x5a9   :  { %2142 = vmatprep.subr.bf16.mxu0 %v2596_v0 }
 0x5ac   :  { %2144 = vmatpush3.bf16.msra.mxu0 %v2143_v56 }
 0x5ad   :  { %2145 = vmatprep.subr.bf16.mxu0 %v2596_v0 }
 0x5b0   :  { %2147 = vmatpush3.bf16.msra.mxu0 %v2146_v62  ;;  %v1231_v62 = vld [vmem:[#allocation19 + $0x8] sm:$0xff] }
 0x5b1   :  { %2148 = vmatprep.subr.bf16.mxu0 %v2596_v0  ;;  %v2179_v2 = vpack.c.bf16 %v1231_v62, %v1230_v61 }
 0x5b4   :  { %2150 = vmatpush3.bf16.msra.mxu0 %v2149_v6  ;;  %v1234_v6 = vld [vmem:[#allocation19 + $0x20] sm:$0xff] }
 0x5b5   :  { %2151 = vmatprep.subr.bf16.mxu0 %v2596_v0  ;;  %v2185_v8 = vpack.c.bf16 %v1235_v7, %v1234_v6 }
 0x5b8   :  { %2153 = vmatpush3.bf16.msra.mxu0 %v2152_v12  ;;  %v1238_v12 = vld [vmem:[#allocation19 + $0x40] sm:$0xff] }
 0x5b9   :  { %1906 = vmatprep.subr.mxu0 %v2598_v1 }
 0x66e   :  { %v810_v14 = vpop.f32.mrb[4].mxu0 }
 0x66f   :  { %v811_v15 = vadd.f32 %v1435_v13, %v810_v14  ;;  %v1800_v16 = vpop.f32.mrb[5].mxu0  ;;  %v1239_v13 = vld [vmem:[#allocation19 + $0x48] sm:$0xff] }
 0x670   :  { %v2191_v14 = vpack.c.bf16 %v1239_v13, %v1238_v12 }
 0x671   :  { %2249 = vtanh.f32 %v811_v15  ;;  %v1241_v15 = vld [vmem:[#allocation19 + $0x58] sm:$0xff] }
 0x67b   :  { %v2250_v20 = vpop.eup %2249 }
 0x67c   :  { %v2952_v22 = vadd.f32 %v2250_v20, %v2934_v40  ;;  %v2173_v40 = vpack.c.bf16 %v1002_v39, %v1001_v38  ;;  %v2197_v20 = vpack.c.bf16 %v1243_v18, %v1242_v17  ;;  %v1326_v38 = vld [vmem:[#allocation20 + $0x48] sm:$0xff] }
 0x67e   :  { %1834 = vmatmul.mubr.f32.vlgmr.msra.gmra.mrb[8].mxu1 %v2952_v22  ;;  %1869 = vmatmul.mubr.f32.vlgmr.msra.gmra.mrb[6].mxu0 %v2952_v22 }
 0x67f   :  { %2156 = vmatpush3.bf16.msra.mxu1 %v2155_v21  ;;  %1903 = vmatprep.mubr.msk.f32.mxu1 %vm2597_vm0, %v2598_v1  ;;  %v1244_v21 = vld [vmem:[#allocation19 + $0x70] sm:$0xff] }
 0x680   :  { %2157 = vmatprep.subr.bf16.mxu1 %v2596_v0  ;;  %1908 = vmatprep.mubr.msk.f32.mxu0 %vm2597_vm0, %v2598_v1  ;;  %v2200_v24 = vpack.c.bf16 %v1245_v23, %v1244_v21 }
 0x683   :  { %2159 = vmatpush3.bf16.msra.mxu1 %v2158_v25  ;;  %v1317_v25 = vld [vmem:[#allocation20] sm:$0xff] }
 0x684   :  { %2160 = vmatprep.subr.bf16.mxu1 %v2596_v0 }
 0x687   :  { %2162 = vmatpush3.bf16.msra.mxu1 %v2161_v28  ;;  %v2203_v28 = vpack.c.bf16 %v1318_v26, %v1317_v25 }
 0x688   :  { %2163 = vmatprep.subr.bf16.mxu1 %v2596_v0 }
 0x68b   :  { %2165 = vmatpush3.bf16.msra.mxu1 %v2164_v31  ;;  %v1321_v31 = vld [vmem:[#allocation20 + $0x20] sm:$0xff] }
 0x68c   :  { %2166 = vmatprep.subr.bf16.mxu1 %v2596_v0  ;;  %v2209_v33 = vpack.c.bf16 %v1322_v32, %v1321_v31 }
 0x68f   :  { %2168 = vmatpush3.bf16.msra.mxu1 %v2167_v34  ;;  %v1323_v34 = vld [vmem:[#allocation20 + $0x30] sm:$0xff] }
 0x690   :  { %2169 = vmatprep.subr.bf16.mxu1 %v2596_v0  ;;  %v2212_v36 = vpack.c.bf16 %v1324_v35, %v1323_v34 }
 0x693   :  { %2171 = vmatpush3.bf16.msra.mxu1 %v2170_v37  ;;  %v1325_v37 = vld [vmem:[#allocation20 + $0x40] sm:$0xff] }
 0x694   :  { %2172 = vmatprep.subr.bf16.mxu1 %v2596_v0  ;;  %v2215_v39 = vpack.c.bf16 %v1326_v38, %v1325_v37 }
 0x697   :  { %2174 = vmatpush3.bf16.msra.mxu1 %v2173_v40  ;;  %v1327_v40 = vld [vmem:[#allocation20 + $0x50] sm:$0xff] }
 0x698   :  { %2175 = vmatprep.subr.bf16.mxu1 %v2596_v0  ;;  %v2218_v42 = vpack.c.bf16 %v1328_v41, %v1327_v40 }
 0x69b   :  { %2177 = vmatpush3.bf16.msra.mxu1 %v2176_v43  ;;  %v1329_v43 = vld [vmem:[#allocation20 + $0x60] sm:$0xff] }
 0x69c   :  { %2202 = vmatprep.subr.bf16.mxu1 %v2596_v0 }
 0x69e   :  { %1904 = vmatmul.mubr.f32.vlgmr.msra.gmra.mrb[10].mxu1 %v2952_v22 }
 0x69f   :  { %1983 = vmatprep.mubr.msk.f32.mxu1 %vm2597_vm0, %v2598_v1  ;;  %2204 = vmatpush3.bf16.msra.mxu1 %v2203_v28 }
 0x6a0   :  { %2205 = vmatprep.subr.bf16.mxu1 %v2596_v0 }
 0x6a3   :  { %2207 = vmatpush3.bf16.msra.mxu1 %v2206_v30 }
 0x6a4   :  { %2208 = vmatprep.subr.bf16.mxu1 %v2596_v0 }
 0x6a7   :  { %2210 = vmatpush3.bf16.msra.mxu1 %v2209_v33 }
 0x6a8   :  { %2211 = vmatprep.subr.bf16.mxu1 %v2596_v0 }
 0x6ab   :  { %2213 = vmatpush3.bf16.msra.mxu1 %v2212_v36 }
 0x6ac   :  { %2214 = vmatprep.subr.bf16.mxu1 %v2596_v0 }
 0x6af   :  { %2216 = vmatpush3.bf16.msra.mxu1 %v2215_v39 }
 0x6b0   :  { %2217 = vmatprep.subr.bf16.mxu1 %v2596_v0 }
 0x6b3   :  { %2219 = vmatpush3.bf16.msra.mxu1 %v2218_v42 }
 0x6b4   :  { %2220 = vmatprep.subr.bf16.mxu1 %v2596_v0 }
 0x751   :  { %v898_v44 = vpop.f32.mrb[8].mxu1  ;;  %v985_v45 = vpop.f32.mrb[6].mxu0 }
 0x752   :  { %v902_v46 = vmul.f32 0.17677669, %v898_v44  ;;  %v1835_v47 = vpop.f32.mrb[9].mxu1  ;;  %v1870_v50 = vpop.f32.mrb[7].mxu0  ;;  %1907 = vmatpush3.xpose.msra.mxu0 %v985_v45  ;;  %v1330_v44 = vld [vmem:[#allocation20 + $0x68] sm:$0xff] }
 0x753   :  { %1911 = vmatprep.subr.mxu0 %v2598_v1  ;;  %v2221_v45 = vpack.c.bf16 %v1330_v44, %v1329_v43  ;;  %v1331_v50 = vld [vmem:[#allocation20 + $0x70] sm:$0xff] }
 0x755   :  { %1909 = vmatmul.mubr.f32.vlgmr.msra.gmra.mrb[8].mxu0 %v902_v46  ;;  %2222 = vmatpush3.bf16.msra.mxu1 %v2221_v45 }
 0x756   :  { %1913 = vmatprep.mubr.msk.f32.mxu0 %vm2597_vm0, %v2598_v1  ;;  %2223 = vmatprep.subr.bf16.mxu1 %v2596_v0 }
 0x771   :  { %v1071_v48 = vpop.f32.mrb[10].mxu1 }
 0x772   :  { %v1905_v49 = vpop.f32.mrb[11].mxu1  ;;  %1912 = vmatpush3.msra.mxu0 %v1071_v48  ;;  %v1332_v48 = vld [vmem:[#allocation20 + $0x78] sm:$0xff] }
 0x773   :  { %2178 = vmatprep.subr.bf16.mxu0 %v2596_v0  ;;  %v2224_v49 = vpack.c.bf16 %v1332_v48, %v1331_v50 }
 0x775   :  { %2225 = vmatpush3.bf16.msra.mxu1 %v2224_v49 }
 0x828   :  { %v1141_v51 = vpop.f32.mrb[8].mxu0 }
 0x829   :  { %v1145_v52 = vsel %vm217_vm1, %v1141_v51, -1e+30  ;;  %v1910_v53 = vpop.f32.mrb[9].mxu0 }
 0x82a   :  { %v1146_v54 = vsel %vm549_vm2, %v1145_v52, -inf }
 0x82b   :  { %1147 = vmax.xlane.f32.xlu1 %v1146_v54  ;;  %v1437_v54 = vld [vmem:[#allocation22] ss:$0 sm:$0xff] }
 0x8b8   :  { %v1148_v55 = vpop.xlane.xlu1 %1147 }
 0x8b9   :  { %v1149_v56 = vsub.f32 %v1145_v52, %v1148_v55 }
 0x8bb   :  { %v1150_v57 = vmul.f32 1.442695, %v1149_v56 }
 0x8bd   :  { %2251 = vpow2.f32 %v1150_v57 }
 0x8c7   :  { %v2252_v58 = vpop.eup %2251 }
 0x8c8   :  { %v1152_v59 = vsel %vm549_vm2, %v2252_v58, 0.0 }
 0x8c9   :  { %1153 = vadd.xlane.f32.xlu1 %v1152_v59 }
 0x956   :  { %v1154_v60 = vpop.xlane.xlu1 %1153 }
 0x957   :  { %2253 = vrcp.f32 %v1154_v60 }
 0x961   :  { %v2254_v63 = vpop.eup %2253 }
 0x962   :  { %v1156_v19 = vmul.f32 %v2254_v63, %v2252_v58 }
 0x964   :  { %1914 = vmatmul.mubr.msk.f32.vlgmr.msra.gmra.mrb[10].mxu0 %vm549_vm2, %v1156_v19 }
 0x965   :  { %2180 = vmatpush3.bf16.msra.mxu0 %v2179_v2  ;;  %1948 = vmatprep.mubr.msk.f32.mxu0 %vm2597_vm0, %v2598_v1  ;;  %v1240_v1 = vld [vmem:[#allocation19 + $0x50] sm:$0xff] }
 0x966   :  { %2181 = vmatprep.subr.bf16.mxu0 %v2596_v0  ;;  %v2194_v16 = vpack.c.bf16 %v1241_v15, %v1240_v1 }
 0x969   :  { %2183 = vmatpush3.bf16.msra.mxu0 %v2182_v5 }
 0x96a   :  { %2184 = vmatprep.subr.bf16.mxu0 %v2596_v0 }
 0x96d   :  { %2186 = vmatpush3.bf16.msra.mxu0 %v2185_v8 }
 0x96e   :  { %2187 = vmatprep.subr.bf16.mxu0 %v2596_v0 }
 0x971   :  { %2189 = vmatpush3.bf16.msra.mxu0 %v2188_v11 }
 0x972   :  { %2190 = vmatprep.subr.bf16.mxu0 %v2596_v0 }
 0x975   :  { %2192 = vmatpush3.bf16.msra.mxu0 %v2191_v14 }
 0x976   :  { %2193 = vmatprep.subr.bf16.mxu0 %v2596_v0 }
 0x979   :  { %2195 = vmatpush3.bf16.msra.mxu0 %v2194_v16 }
 0x97a   :  { %2196 = vmatprep.subr.bf16.mxu0 %v2596_v0 }
 0x97d   :  { %2198 = vmatpush3.bf16.msra.mxu0 %v2197_v20 }
 0x97e   :  { %2199 = vmatprep.subr.bf16.mxu0 %v2596_v0 }
 0x981   :  { %2201 = vmatpush3.bf16.msra.mxu0 %v2200_v24 }
 0xa37   :  { %v1226_v46 = vpop.f32.mrb[10].mxu0 }
 0xa38   :  { %v1915_v47 = vpop.f32.mrb[11].mxu0  ;;  %1949 = vmatmul.mubr.f32.vlgmr.msra.gmra.mrb[12].mxu0 %v1226_v46 }
 0xb0b   :  { %v1312_v51 = vpop.f32.mrb[12].mxu0 }
 0xb0c   :  { %v1316_v52 = vadd.f32 %v1312_v51, %v2952_v22  ;;  %v1950_v53 = vpop.f32.mrb[13].mxu0 }
 0xb0e   :  { %1984 = vmatmul.mubr.f32.vlgmr.msra.gmra.mrb[12].mxu1 %v1316_v52 }
 0xbe1   :  { %v1406_v55 = vpop.f32.mrb[12].mxu1 }
 0xbe2   :  { %v1407_v56 = vadd.f32 %v1437_v54, %v1406_v55  ;;  %v1985_v57 = vpop.f32.mrb[13].mxu1 }
 0xbe4   :  { %2255 = vtanh.f32 %v1407_v56 }
 0xbee   :  { %v2256_v0 = vpop.eup %2255 }
 0xbef   :  { %v1411_v58 = vadd.f32 %v2256_v0, %v1316_v52 }
 0xbf1   :  { %1412 = vst [vmem:[#allocation23] sm:$0xff] %v1411_v58 }
 0xbf2   :  { %2554 = shalt.err (!%p2551_p10)
}
 0xbf3   :  { %s2555_s5 = scalar_lea.hbm %s3022_s13, 128 }
 0xbf4   :  { %p2556_p11 = scmp.ne.s32.totalorder %s3022_s13, %s2555_s5  ;;  %p2559_p12 = scmp.lt.u32.totalorder %s2555_s5, %s3022_s13 }
 0xbf6   :  { %p2561_p13 = pnand %p2559_p12, %p2556_p11 }
 0xbf8   :  { %2564 = shalt.err (!%p2561_p13)
}
 0xbf9   :  { %1422 = dma.vmem_to_hbm [thread:$0]  %s1420_s19, 128, %s3022_s13, [#allocation4]  }
 0xbfa   :  { %2579 = dma.done.wait [#allocation4], 128  }
 0xbfb   :  { %2580 = vsyncadd [#allocation4], 4294967168 }
 0xbfc   :  { %1426 = vsyncpa [#allocation3], 1 }
 0xbfd   :  { %1427 = vsyncpa [#allocation6], 1 }
 0xbfe   :  { %1428 = vsyncpa [#allocation9], 1 }
 0xbff   :  { %1429 = vsyncpa [#allocation12], 1 }
 0xc00   :  { %1430 = vsyncpa [#allocation15], 1 }
 0xc01   :  { %1431 = vsyncpa [#allocation18], 1 }
 0xc02   :  { %1432 = vsyncpa [#allocation21], 1 }
 0xc03   :  { %1433 = vsyncpa [#allocation4], 1 }

</bundles_post_ra>
